<compile_context>
chip_gen: v7x
topology: tpu7x:2x2x1
jax: 0.10.0
libtpu: 0.0.40
codegen_flags: <defaults>
</compile_context>

<pallas_src>
import functools
import numpy as np

import jax
import jax.numpy as jnp
from jax.experimental import pallas as pl
from jax.experimental.pallas import tpu as pltpu


# ----------------------------------------------------------------------------
# small helpers
# ----------------------------------------------------------------------------
def _round_up(x, m):
    return (x + m - 1) // m * m


def _pad_axis_to(x, size, axis):
    pad = size - x.shape[axis]
    if pad == 0:
        return x
    cfg = [(0, 0)] * x.ndim
    cfg[axis] = (0, pad)
    return jnp.pad(x, cfg)


def _pick_block(dim, max_block, align):
    """Return (block, padded_dim): block % align == 0, block | padded_dim."""
    dim_p = _round_up(dim, align)
    if dim_p <= max_block:
        return dim_p, dim_p
    blk = None
    for cand in range(max_block - max_block % align, align - 1, -align):
        if dim_p % cand == 0:
            blk = cand
            break
    if blk is None or blk * 4 < max_block:       # avoid degenerate tiny blocks
        blk = max_block - max_block % align
        dim_p = _round_up(dim_p, blk)
    return blk, dim_p


# ----------------------------------------------------------------------------
# Pallas kernels: fused matmul (+ optional per-column scale/shift + ReLU)
# ----------------------------------------------------------------------------
def _mm_kernel_1k(*refs, apply_affine, apply_relu):
    """Single K-block matmul (grid (i, j)); no accumulator scratch needed."""
    if apply_affine:
        a_ref, b_ref, scale_ref, shift_ref, o_ref = refs
    else:
        a_ref, b_ref, o_ref = refs
    y = jnp.dot(a_ref[...], b_ref[...], preferred_element_type=jnp.float32)
    if apply_affine:
        y = y * scale_ref[...] + shift_ref[...]
    if apply_relu:
        y = jnp.maximum(y, 0.0)
    o_ref[...] = y.astype(o_ref.dtype)


def _mm_kernel_nk(*refs, apply_affine, apply_relu):
    """K-tiled matmul with f32 VMEM accumulator (grid (i, j, k), k arbitrary)."""
    if apply_affine:
        a_ref, b_ref, scale_ref, shift_ref, o_ref, acc_ref = refs
    else:
        a_ref, b_ref, o_ref, acc_ref = refs
    k = pl.program_id(2)

    @pl.when(k == 0)
    def _():
        acc_ref[...] = jnp.zeros_like(acc_ref)

    acc_ref[...] += jnp.dot(a_ref[...], b_ref[...],
                            preferred_element_type=jnp.float32)

    @pl.when(k == pl.num_programs(2) - 1)
    def _():
        y = acc_ref[...]
        if apply_affine:
            y = y * scale_ref[...] + shift_ref[...]
        if apply_relu:
            y = jnp.maximum(y, 0.0)
        o_ref[...] = y.astype(o_ref.dtype)


def matmul_fused(a, b, scale=None, shift=None, *, apply_relu=False,
                 out_dtype=jnp.float32, tm_max=1024, tn_max=512, tk_max=512):
    """act((a @ b) * scale + shift); a:(M,K) b:(K,N) scale/shift:(N,) or None.

    Operands are cast to bf16 (MXU-native); accumulation and epilogue stay f32.
    """
    M, K = a.shape
    K2, N = b.shape
    assert K == K2
    apply_affine = scale is not None

    tm, Mp = _pick_block(M, tm_max, 8)
    tn, Np = _pick_block(N, tn_max, 128)
    Kp = _round_up(K, 8)
    if Kp <= tk_max:
        tk = Kp                               # K fits in one block (all layers here)
    else:
        tk, Kp = _pick_block(K, tk_max, 128)
    nk = Kp // tk

    a_p = _pad_axis_to(_pad_axis_to(a.astype(jnp.bfloat16), Mp, 0), Kp, 1)
    b_p = _pad_axis_to(_pad_axis_to(b.astype(jnp.bfloat16), Kp, 0), Np, 1)
    operands = [a_p, b_p]
    if apply_affine:
        operands.append(_pad_axis_to(scale.astype(jnp.float32).reshape(1, -1), Np, 1))
        operands.append(_pad_axis_to(shift.astype(jnp.float32).reshape(1, -1), Np, 1))

    if nk == 1:
        grid = (Mp // tm, Np // tn)
        in_specs = [pl.BlockSpec((tm, tk), lambda i, j: (i, 0)),
                    pl.BlockSpec((tk, tn), lambda i, j: (0, j))]
        if apply_affine:
            in_specs += [pl.BlockSpec((1, tn), lambda i, j: (0, j)),
                         pl.BlockSpec((1, tn), lambda i, j: (0, j))]
        out_specs = pl.BlockSpec((tm, tn), lambda i, j: (i, j))
        scratch = []
        kernel = functools.partial(_mm_kernel_1k, apply_affine=apply_affine,
                                   apply_relu=apply_relu)
        dims = ("parallel", "parallel")
    else:
        grid = (Mp // tm, Np // tn, nk)
        in_specs = [pl.BlockSpec((tm, tk), lambda i, j, k: (i, k)),
                    pl.BlockSpec((tk, tn), lambda i, j, k: (k, j))]
        if apply_affine:
            in_specs += [pl.BlockSpec((1, tn), lambda i, j, k: (0, j)),
                         pl.BlockSpec((1, tn), lambda i, j, k: (0, j))]
        out_specs = pl.BlockSpec((tm, tn), lambda i, j, k: (i, j))
        scratch = [pltpu.VMEM((tm, tn), jnp.float32)]
        kernel = functools.partial(_mm_kernel_nk, apply_affine=apply_affine,
                                   apply_relu=apply_relu)
        dims = ("parallel", "parallel", "arbitrary")

    out = pl.pallas_call(
        kernel,
        out_shape=jax.ShapeDtypeStruct((Mp, Np), out_dtype),
        grid_spec=pltpu.PrefetchScalarGridSpec(
            num_scalar_prefetch=0, grid=grid, in_specs=in_specs,
            out_specs=out_specs, scratch_shapes=scratch),
        compiler_params=pltpu.CompilerParams(
            dimension_semantics=dims,
            vmem_limit_bytes=32 * 1024 * 1024),
    )(*operands)
    return out[:M, :N]


# ----------------------------------------------------------------------------
# ConvTranspose2d(kernel=4, stride=2, padding=1, bias=False) as ONE matmul
# (M=B*H*W, K=Cin, N=16*Cout) + col2im overlap-add epilogue (+ BN shift + ReLU).
# ----------------------------------------------------------------------------
def conv_transpose_4x4_s2_p1(x_nhwc, w, scale=None, shift=None, *,
                             apply_relu=False, out_dtype=jnp.float32):
    """x_nhwc: (B,H,W,Cin); w: PyTorch layout (Cin,Cout,4,4) -> (B,2H,2W,Cout)."""
    B, H, W, Cin = x_nhwc.shape
    Cout = w.shape[1]

    # Fold the (linear) BN scale into the weights; shift/ReLU are per output
    # pixel, so they go after the overlap-add.
    w = w.astype(jnp.float32)
    if scale is not None:
        w = w * scale[None, :, None, None]
    # (Cin, Cout, 4, 4) -> (Cin, ky, kx, Cout) -> (Cin, 16*Cout)
    w_mat = jnp.transpose(w, (0, 2, 3, 1)).reshape(Cin, 16 * Cout)

    # z[n,iy,ix,ky,kx,co] = sum_ci x[n,iy,ix,ci] * w[ci,co,ky,kx]
    a = x_nhwc.reshape(B * H * W, Cin)
    z = matmul_fused(a, w_mat, out_dtype=jnp.bfloat16)
    z = z.reshape(B, H, W, 4, 4, Cout)
    zp = jnp.pad(z, ((0, 0), (1, 1), (1, 1), (0, 0), (0, 0), (0, 0)))

    # col2im / overlap-add:
    #   out[n, 2m+a, 2l+b, :] =
    #     sum_{dy,dx in {0,1}} z[n, m+a+dy-1, l+b+dx-1, (3-a)-2dy, (3-b)-2dx, :]
    rows = []
    for aa in (0, 1):
        cols = []
        for bb in (0, 1):
            acc = None
            for dy in (0, 1):
                for dx in (0, 1):
                    ky = (3 - aa) - 2 * dy
                    kx = (3 - bb) - 2 * dx
                    t = zp[:, aa + dy:aa + dy + H, bb + dx:bb + dx + W, ky, kx, :]
                    t = t.astype(jnp.float32)
                    acc = t if acc is None else acc + t
            cols.append(acc)
        rows.append(jnp.stack(cols, axis=3))     # (B,H,W,2,Cout): [n,m,l,bb,c]
    out = jnp.stack(rows, axis=2)                # (B,H,2,W,2,Cout): [n,m,aa,l,bb,c]
    out = out.reshape(B, 2 * H, 2 * W, Cout)

    if shift is not None:
        out = out + shift
    if apply_relu:
        out = jnp.maximum(out, 0.0)
    return out.astype(out_dtype)


# ----------------------------------------------------------------------------
# Parameter init (deterministic, synthetic) and full forward pass
# ----------------------------------------------------------------------------
IN_DIM = 10
OUT_CHANNELS = 3
CONV_CFG = [  # (name, Cin, Cout, has_bn_relu)
    ("ct1", 512, 512, True),
    ("ct2", 512, 256, True),
    ("ct3", 256, 128, True),
    ("ct4", 128, 64, True),
    ("ct5", 64, OUT_CHANNELS, False),
]
BN_EPS = 1e-5


def _bn_params(key, c):
    k1, k2, k3, k4 = jax.random.split(key, 4)
    gamma = 1.0 + 0.1 * jax.random.normal(k1, (c,), jnp.float32)
    beta = 0.1 * jax.random.normal(k2, (c,), jnp.float32)
    mean = 0.1 * jax.random.normal(k3, (c,), jnp.float32)
    var = jax.random.uniform(k4, (c,), jnp.float32, 0.5, 1.5)
    scale = gamma * jax.lax.rsqrt(var + BN_EPS)
    shift = beta - mean * scale
    return scale, shift


def init_decoder_params(key):
    keys = jax.random.split(key, 2 + 2 * len(CONV_CFG) + 1)
    p = {}
    # Linear(in_dim, 512*7*7) with bias.
    p["fc_w"] = (jax.random.normal(keys[0], (IN_DIM, 512 * 7 * 7), jnp.float32)
                 / np.sqrt(IN_DIM))
    p["fc_b"] = 0.01 * jax.random.normal(keys[1], (512 * 7 * 7,), jnp.float32)
    # BatchNorm2d(512) right after the reshape.
    p["bn0_scale"], p["bn0_shift"] = _bn_params(keys[2], 512)
    ki = 3
    for name, cin, cout, has_bn in CONV_CFG:
        std = 1.0 / np.sqrt(cin * 16)
        p[name + "_w"] = std * jax.random.normal(keys[ki], (cin, cout, 4, 4),
                                                 jnp.float32)
        ki += 1
        if has_bn:
            p[name + "_bn_scale"], p[name + "_bn_shift"] = _bn_params(keys[ki], cout)
            ki += 1
    return p


def decoder_forward(params, x):
    """x: (B, in_dim) -> (B, out_channels, 224, 224)  (NCHW, like PyTorch)."""
    B = x.shape[0]
    # Linear -> Reshape(512,7,7) -> BN(512) -> ReLU, fused into one matmul.
    # Column c maps to channel c // 49, so expand BN scale/shift per column and
    # fold the linear bias into the shift.
    scale_full = jnp.repeat(params["bn0_scale"], 49)
    shift_full = jnp.repeat(params["bn0_shift"], 49) + params["fc_b"] * scale_full
    h = matmul_fused(x, params["fc_w"], scale_full, shift_full,
                     apply_relu=True, out_dtype=jnp.bfloat16, tn_max=2048)
    h = h.reshape(B, 512, 7, 7).transpose(0, 2, 3, 1)       # NCHW -> NHWC

    n_layers = len(CONV_CFG)
    for li, (name, cin, cout, has_bn) in enumerate(CONV_CFG):
        sc = params[name + "_bn_scale"] if has_bn else None
        sh = params[name + "_bn_shift"] if has_bn else None
        h = conv_transpose_4x4_s2_p1(
            h, params[name + "_w"], sc, sh, apply_relu=has_bn,
            out_dtype=jnp.float32 if li == n_layers - 1 else jnp.bfloat16)

    return h.transpose(0, 3, 1, 2)                          # NHWC -> NCHW


# ----------------------------------------------------------------------------
# Tiny brute-force reference for the transposed-conv decomposition (sanity).
# ----------------------------------------------------------------------------
def _ref_conv_transpose_nchw(x_nchw, w):
    B, Cin, H, W = x_nchw.shape
    Cout = w.shape[1]
    Ho, Wo = 2 * H, 2 * W
    y = np.zeros((B, Cout, Ho, Wo), np.float32)
    for n in range(B):
        for ci in range(Cin):
            for iy in range(H):
                for ix in range(W):
                    v = x_nchw[n, ci, iy, ix]
                    for ky in range(4):
                        for kx in range(4):
                            oy = 2 * iy - 1 + ky
                            ox = 2 * ix - 1 + kx
                            if 0 <= oy < Ho and 0 <= ox < Wo:
                                y[n, :, oy, ox] += v * w[ci, :, ky, kx]
    return y


if __name__ == "__main__":
    key = jax.random.PRNGKey(0)

    # --- sanity check of the conv-transpose decomposition at a tiny size ---
    kc1, kc2, key = jax.random.split(key, 3)
    xt = jax.random.normal(kc1, (1, 3, 3, 2), jnp.float32)        # NHWC
    wt = jax.random.normal(kc2, (2, 3, 4, 4), jnp.float32)        # (Cin,Cout,4,4)
    got = conv_transpose_4x4_s2_p1(xt, wt)                        # no BN / ReLU
    got = np.asarray(jax.block_until_ready(got)).transpose(0, 3, 1, 2)
    ref = _ref_conv_transpose_nchw(np.asarray(xt).transpose(0, 3, 1, 2),
                                   np.asarray(wt))
    # bf16 operands -> loose tolerance; still catches any tap-mapping mistake.
    assert np.allclose(got, ref, rtol=5e-2, atol=5e-2), \
        float(np.max(np.abs(got - ref)))

    # --- full decoder forward ---
    kp, kx = jax.random.split(key)
    params = init_decoder_params(kp)
    x = jax.random.normal(kx, (2, IN_DIM), jnp.float32)           # batch=2

    fwd = jax.jit(decoder_forward)
    out = fwd(params, x)
    out = jax.block_until_ready(out)

    assert out.shape == (2, OUT_CHANNELS, 224, 224), out.shape
    assert bool(jnp.all(jnp.isfinite(out)))
    print("KERNEL_OK")
</pallas_src>

<mosaic_0001>
module attributes {stable_mosaic.version = 11 : i64} {
  func.func @_mm_kernel_1k(%arg0: i32, %arg1: i32, %arg2: memref<16x8xbf16, #tpu.memory_space<vmem>>, %arg3: memref<8x128xbf16, #tpu.memory_space<vmem>>, %arg4: memref<16x128xbf16, #tpu.memory_space<vmem>>) attributes {dimension_semantics = [#tpu.dimension_semantics<parallel>, #tpu.dimension_semantics<parallel>], iteration_bounds = array<i64: 1, 1>, scalar_prefetch = 0 : i64, scratch_operands = 0 : i64, tpu.core_type = #tpu.core_type<tc>, window_params = [{transform_indices = @transform_0, window_bounds = array<i64: 16, 8>}, {transform_indices = @transform_1, window_bounds = array<i64: 8, 128>}, {transform_indices = @transform_2, window_bounds = array<i64: 16, 128>}]} {
    %c0 = arith.constant 0 : index
    %c0_0 = arith.constant 0 : index
    %0 = vector.load %arg2[%c0, %c0_0] : memref<16x8xbf16, #tpu.memory_space<vmem>>, vector<16x8xbf16>
    %c0_1 = arith.constant 0 : index
    %c0_2 = arith.constant 0 : index
    %1 = vector.load %arg3[%c0_1, %c0_2] : memref<8x128xbf16, #tpu.memory_space<vmem>>, vector<8x128xbf16>
    %cst = arith.constant dense<0.000000e+00> : vector<16x128xf32>
    %2 = tpu.matmul %0, %1, %cst {dimension_numbers = #tpu.dot_dimension_numbers<[1], [0], [0], [1], [0, 0, 1, 1], [], []>} : vector<16x8xbf16>, vector<8x128xbf16>, vector<16x128xf32> -> vector<16x128xf32>
    %3 = arith.truncf %2 : vector<16x128xf32> to vector<16x128xbf16>
    %c0_3 = arith.constant 0 : index
    %c0_4 = arith.constant 0 : index
    %4 = vector.load %arg4[%c0_3, %c0_4] : memref<16x128xbf16, #tpu.memory_space<vmem>>, vector<16x128xbf16>
    tpu.vector_store %arg4[%c0_3, %c0_4], %3 {strides = array<i32>} : memref<16x128xbf16, #tpu.memory_space<vmem>>, vector<16x128xbf16>,
    return
  }
  func.func @transform_0(%arg0: i32, %arg1: i32) -> (i32, i32) {
    %c0_i32 = arith.constant 0 : i32
    %c0_i32_0 = arith.constant 0 : i32
    return %arg0, %c0_i32 : i32, i32
  }
  func.func @transform_1(%arg0: i32, %arg1: i32) -> (i32, i32) {
    %c0_i32 = arith.constant 0 : i32
    %c0_i32_0 = arith.constant 0 : i32
    return %c0_i32, %arg1 : i32, i32
  }
  func.func @transform_2(%arg0: i32, %arg1: i32) -> (i32, i32) {
    %c0_i32 = arith.constant 0 : i32
    return %arg0, %arg1 : i32, i32
  }
}

</mosaic_0001>

<bundles_post_ra>
// kernel: tpu_custom_call.1
= control target key start
LH: loop header
LB: loop body
LE: loop exit
PB: predicated region body
PF: predicated region fallthrough
CT: control target
= control target key end

     0   :  { %vm25_vm0 = vcmask 1043456   ;;  %v145_v1 = vmov 0.0   ;;  %vm146_vm1 = vmmov 0   ;;  %vm21_vm2 = vcmask 64512   ;;  %s183_s0 = inlined_call_operand.vmem [shape: bf16[16,8], index: 0, kind: input, shape index: {}]   ;;  %s184_s1 = inlined_call_operand.vmem [shape: bf16[8,128], index: 1, kind: input, shape index: {}]   ;;  %s185_s2 = inlined_call_operand.hbm [shape: bf16[16,128], index: 2, kind: output, shape index: {}]  }
   0x1   :  { %v15_v0 = vld [vmem:[%s184_s1] sm:$0xf]  ;;  %109 = vmatprep.subr.bf16.mxu0 %v145_v1  ;;  %111 = vmatprep.mubr.msk.bf16.mxu0 %vm146_vm1, %v145_v1 }
   0x2   :  { %v27_v2 = vsel %vm25_vm0, %v15_v0, 0  ;;  %v120_v3 = vld [vmem:[%s183_s0] sm:$0xff]  }
   0x3   :  { %110 = vmatpush3.bf16.msra.mxu0 %v27_v2 }
   0x4   :  { %7 = vsyncpa [#allocation3], 0  ;;  %s147_s13 = smov [#allocation2]  }
   0x5   :  { %s85_s14 = sshll.u32 %s147_s13, 4  ;;  %s86_s14 = int_to_ptr.vmem [resolvable:$true] %s85_s14 }
   0x6   :  { %112 = vmatmul.mubr.msk.bf16.vlgmr.msra.gmra.mrb[0].mxu0 %vm21_vm2, %v120_v3  ;;  %s121_s1 = scalar_lea.vmem %s86_s14, 128  ;;  %p126_p1 = scmp.lt.s32.totalorder %s86_s14, %s86_s14 }
   0x7   :  { %p122_p0 = scmp.ne.s32.totalorder %s86_s14, %s121_s1  ;;  %p127_p2 = scmp.lt.s32.totalorder %s121_s1, %s121_s1 }
   0x9   :  { %p128_p3 = por %p127_p2, %p126_p1 }
   0xb   :  { %p129_p4 = pnand %p128_p3, %p122_p0 }
  0xd9   :  { %v63_v4 = vpop.f32.mrb[0].mxu0 }
  0xda   :  { %v113_v5 = vpop.f32.mrb[1].mxu0 }
  0xdb   :  { %v66_v6 = vpop.f32.mrb[2].mxu0 }
  0xdc   :  { %v105_v7 = vpack.c.bf16 %v66_v6, %v63_v4  ;;  %v114_v8 = vpop.f32.mrb[3].mxu0 }
  0xde   :  { %106 = vst [vmem:[#allocation2] sm:$0xff] %v105_v7  }
  0xdf   :  { %132 = shalt.err (!%p129_p4)
}
  0xe0   :  { %s133_s16 = scalar_lea.hbm %s185_s2, 128 }
  0xe1   :  { %p134_p5 = scmp.ne.s32.totalorder %s185_s2, %s133_s16  ;;  %p137_p6 = scmp.lt.u32.totalorder %s133_s16, %s185_s2 }
  0xe3   :  { %p139_p7 = pnand %p137_p6, %p134_p5 }
  0xe5   :  { %142 = shalt.err (!%p139_p7)
}
  0xe6   :  { %s148_s21 = smov 64   ;;  %s149_s22 = smov 4  }
  0xe7   :  { %91 = dma.vmem_to_hbm [thread:$0]  %s86_s14, 128, %s185_s2, [#allocation3], %s148_s21, %s148_s21, %s149_s22  }
  0xe8   :  { %143 = dma.done.wait [#allocation3], 128  }
  0xe9   :  { %144 = vsyncadd [#allocation3], 4294967168 }
  0xea   :  { %95 = vsyncpa [#allocation3], 1 }

</bundles_post_ra>
